<compile_context>
chip_gen: v6e
topology: v6e:2x2x1
jax: 0.10.0
libtpu: 0.0.40
codegen_flags: <defaults>
</compile_context>

<pallas_src>
import functools

import jax
import jax.numpy as jnp
import numpy as np
from jax import lax
from jax.experimental import pallas as pl
from jax.experimental.pallas import tpu as pltpu


def _lossnet_kernel(ind_ref, pred_ref, out_ref, p_acc, *, total_rows, seq_len):
    """One (row-tile, vocab-tile) grid step.

    ind_ref : (R_t, 1)   int32      shifted target indices for this row tile
    pred_ref: (R_t, V_t) f32/bf16   probability slab for this (row, vocab) tile
    out_ref : (1, 8, 128) f32       per-row-tile partial sum (scalar broadcast)
    p_acc   : (R_t, 1)   f32        gathered probability, accumulated over V tiles
    """
    ri = pl.program_id(0)
    vj = pl.program_id(1)
    n_v = pl.num_programs(1)

    r_t, v_t = pred_ref.shape

    @pl.when(vj == 0)
    def _init():
        p_acc[...] = jnp.zeros_like(p_acc)

    # Upcast once per tile (callers may pass bf16 pred -> halved HBM traffic).
    pred = pred_ref[...].astype(jnp.float32)                  # (R_t, V_t)
    ind = ind_ref[...]                                        # (R_t, 1) int32

    # One-hot gather over the lane (vocab) axis against GLOBAL vocab indices.
    v_iota = lax.broadcasted_iota(jnp.int32, (r_t, v_t), 1) + vj * v_t
    onehot = v_iota == ind                                    # broadcast (R_t,1)->(R_t,V_t)
    p_acc[...] += jnp.sum(jnp.where(onehot, pred, 0.0), axis=1, keepdims=True)

    @pl.when(vj == n_v - 1)
    def _finalize():
        # Row-wise weight and validity, computed on (R_t, 1) only.
        r = lax.broadcasted_iota(jnp.int32, (r_t, 1), 0) + ri * r_t
        i = r % seq_len
        valid = (i < seq_len - 1) & (r < total_rows)
        w = jnp.where(
            valid,
            (1.0 - i.astype(jnp.float32) / jnp.float32(seq_len)) ** 2,
            0.0,
        )
        p_safe = jnp.where(valid, p_acc[...], 1.0)            # keep log() finite on masked rows
        partial = jnp.sum(w * jnp.log(p_safe))                # only R_t logs hit the EUP
        out_ref[...] = jnp.broadcast_to(partial, out_ref.shape).astype(jnp.float32)


def _pick_tile(dim, preferred, multiple):
    """Largest divisor of `dim` that is a multiple of `multiple` and <= preferred;
    falls back to the full dim (always a legal block shape)."""
    best = None
    d = multiple
    limit = min(dim, preferred)
    while d <= limit:
        if dim % d == 0:
            best = d
        d += multiple
    return best if best is not None else dim


def lossnet_loss(cap_index, pred, *, row_tile=512, vocab_tile=2048):
    """cap_index: (B, T) int; pred: (B, T, V) float (f32 or bf16). Scalar f32 loss."""
    B, T = cap_index.shape
    assert pred.shape[:2] == (B, T)
    V = pred.shape[2]
    R = B * T

    # ind[b, i] = cap_index[b, i+1]; the wrapped value at i = T-1 is masked
    # in-kernel by the i < T-1 validity, so the roll's wraparound is harmless.
    # NOTE: out-of-range cap_index would silently contribute 0 (one-hot misses)
    # instead of raising like the PyTorch gather.
    ind = jnp.roll(cap_index.astype(jnp.int32), shift=-1, axis=1).reshape(R, 1)
    pred2 = pred.reshape(R, V)  # free reshape; keep native dtype (bf16 ok)

    r_t = _pick_tile(R, row_tile, 8)
    v_t = _pick_tile(V, vocab_tile, 128)
    n_row_tiles = R // r_t
    n_v_tiles = V // v_t

    kernel = functools.partial(_lossnet_kernel, total_rows=R, seq_len=T)

    partials = pl.pallas_call(
        kernel,
        out_shape=jax.ShapeDtypeStruct((n_row_tiles, 8, 128), jnp.float32),
        grid_spec=pltpu.PrefetchScalarGridSpec(
            num_scalar_prefetch=0,
            grid=(n_row_tiles, n_v_tiles),
            in_specs=[
                pl.BlockSpec((r_t, 1), lambda ri, vj: (ri, 0)),      # indices
                pl.BlockSpec((r_t, v_t), lambda ri, vj: (ri, vj)),   # pred slab
            ],
            out_specs=pl.BlockSpec((1, 8, 128), lambda ri, vj: (ri, 0, 0)),
            scratch_shapes=[pltpu.VMEM((r_t, 1), jnp.float32)],
        ),
        compiler_params=pltpu.CompilerParams(
            dimension_semantics=("parallel", "arbitrary")),
    )(ind, pred2)

    # Combine per-row-tile partials (f32) and negate.
    return -jnp.sum(partials[:, 0, 0])


def lossnet_reference(cap_index, pred):
    """Direct port of the PyTorch loops, in numpy, for verification."""
    cap_index = np.asarray(cap_index)
    pred = np.asarray(pred, dtype=np.float64)
    loss_sum = 0.0
    B, T = cap_index.shape
    for b in range(B):
        num = T
        for i in range(T):
            if i + 1 == T:
                break
            ind = cap_index[b, i + 1]
            loss_sum = loss_sum - np.square(1 - i / num) * np.log(pred[b, i, ind])
    return np.float32(loss_sum)


if __name__ == "__main__":
    B, T, V = 2, 8, 32
    key = jax.random.PRNGKey(0)
    k_pred, k_idx = jax.random.split(key)

    # pred must be positive (it goes through log); use softmax probabilities.
    logits = jax.random.normal(k_pred, (B, T, V), dtype=jnp.float32)
    pred = jax.nn.softmax(logits, axis=-1)
    cap_index = jax.random.randint(k_idx, (B, T), 0, V, dtype=jnp.int32)

    loss = jax.block_until_ready(lossnet_loss(cap_index, pred))
    ref = lossnet_reference(cap_index, pred)

    assert np.allclose(np.asarray(loss), ref, rtol=1e-5, atol=1e-5), (loss, ref)
    print("KERNEL_OK")
</pallas_src>

<mosaic_0001>
module attributes {stable_mosaic.version = 11 : i64} {
  func.func @_lossnet_kernel(%arg0: i32, %arg1: i32, %arg2: memref<16x1xi32, #tpu.memory_space<vmem>>, %arg3: memref<16x32xf32, #tpu.memory_space<vmem>>, %arg4: memref<1x8x128xf32, #tpu.memory_space<vmem>>, %arg5: memref<16x1xf32, #tpu.memory_space<vmem>>) attributes {dimension_semantics = [#tpu.dimension_semantics<parallel>, #tpu.dimension_semantics<arbitrary>], iteration_bounds = array<i64: 1, 1>, scalar_prefetch = 0 : i64, scratch_operands = 1 : i64, tpu.core_type = #tpu.core_type<tc>, window_params = [{transform_indices = @transform_0, window_bounds = array<i64: 16, 1>}, {transform_indices = @transform_1, window_bounds = array<i64: 16, 32>}, {transform_indices = @transform_2, window_bounds = array<i64: 1, 8, 128>}]} {
    %c0_i32 = arith.constant 0 : i32
    %0 = arith.cmpi eq, %arg1, %c0_i32 : i32
    %1 = arith.extui %0 : i1 to i32
    %c0_i32_0 = arith.constant 0 : i32
    %2 = arith.cmpi ne, %1, %c0_i32_0 : i32
    scf.if %2 {
      %cst_11 = arith.constant 0.000000e+00 : f32
      %21 = vector.broadcast %cst_11 : f32 to vector<16x1xf32>
      %c0_12 = arith.constant 0 : index
      %c0_13 = arith.constant 0 : index
      %22 = vector.load %arg5[%c0_12, %c0_13] : memref<16x1xf32, #tpu.memory_space<vmem>>, vector<16x1xf32>
      tpu.vector_store %arg5[%c0_12, %c0_13], %21 {strides = array<i32>} : memref<16x1xf32, #tpu.memory_space<vmem>>, vector<16x1xf32>,
    } else {
    }
    %c0 = arith.constant 0 : index
    %c0_1 = arith.constant 0 : index
    %3 = vector.load %arg3[%c0, %c0_1] : memref<16x32xf32, #tpu.memory_space<vmem>>, vector<16x32xf32>
    %c0_2 = arith.constant 0 : index
    %c0_3 = arith.constant 0 : index
    %4 = vector.load %arg2[%c0_2, %c0_3] : memref<16x1xi32, #tpu.memory_space<vmem>>, vector<16x1xi32>
    %5 = tpu.iota {dimensions = array<i32: 1>} : vector<16x32xi32>
    %c32_i32 = arith.constant 32 : i32
    %6 = arith.muli %arg1, %c32_i32 : i32
    %7 = vector.broadcast %6 : i32 to vector<16x32xi32>
    %8 = arith.addi %5, %7 : vector<16x32xi32>
    %9 = vector.broadcast %4 : vector<16x1xi32> to vector<16x32xi32>
    %10 = arith.cmpi eq, %8, %9 : vector<16x32xi32>
    %c0_4 = arith.constant 0 : index
    %c0_5 = arith.constant 0 : index
    %11 = vector.load %arg5[%c0_4, %c0_5] : memref<16x1xf32, #tpu.memory_space<vmem>>, vector<16x1xf32>
    %cst = arith.constant 0.000000e+00 : f32
    %12 = vector.broadcast %cst : f32 to vector<16x32xf32>
    %13 = arith.select %10, %3, %12 : vector<16x32xi1>, vector<16x32xf32>
    %cst_6 = arith.constant dense<0.000000e+00> : vector<16xf32>
    %14 = vector.multi_reduction <add>, %13, %cst_6 [1] : vector<16x32xf32> to vector<16xf32>
    %15 = vector.shape_cast %14 : vector<16xf32> to vector<16x1xf32>
    %16 = arith.addf %11, %15 : vector<16x1xf32>
    %c0_7 = arith.constant 0 : index
    %c0_8 = arith.constant 0 : index
    %17 = vector.load %arg5[%c0_7, %c0_8] : memref<16x1xf32, #tpu.memory_space<vmem>>, vector<16x1xf32>
    tpu.vector_store %arg5[%c0_7, %c0_8], %16 {strides = array<i32>} : memref<16x1xf32, #tpu.memory_space<vmem>>, vector<16x1xf32>,
    %c0_i32_9 = arith.constant 0 : i32
    %18 = arith.cmpi eq, %arg1, %c0_i32_9 : i32
    %19 = arith.extui %18 : i1 to i32
    %c0_i32_10 = arith.constant 0 : i32
    %20 = arith.cmpi ne, %19, %c0_i32_10 : i32
    scf.if %20 {
      %21 = tpu.iota {dimensions = array<i32: 0>} : vector<16x1xi32>
      %c16_i32 = arith.constant 16 : i32
      %22 = arith.muli %arg0, %c16_i32 : i32
      %23 = vector.broadcast %22 : i32 to vector<16x1xi32>
      %24 = arith.addi %21, %23 : vector<16x1xi32>
      %c8_i32 = arith.constant 8 : i32
      %c0_i32_11 = arith.constant 0 : i32
      %25 = arith.cmpi eq, %c8_i32, %c0_i32_11 : i32
      %c1_i32 = arith.constant 1 : i32
      %26 = arith.select %25, %c1_i32, %c8_i32 : i32
      %27 = vector.broadcast %26 : i32 to vector<16x1xi32>
      %28 = arith.remsi %24, %27 : vector<16x1xi32>
      %c0_i32_12 = arith.constant 0 : i32
      %29 = vector.broadcast %c0_i32_12 : i32 to vector<16x1xi32>
      %30 = arith.cmpi ne, %28, %29 : vector<16x1xi32>
      %c0_i32_13 = arith.constant 0 : i32
      %31 = vector.broadcast %c0_i32_13 : i32 to vector<16x1xi32>
      %32 = arith.cmpi slt, %28, %31 : vector<16x1xi32>
      %c0_i32_14 = arith.constant 0 : i32
      %33 = arith.cmpi slt, %26, %c0_i32_14 : i32
      %34 = vector.broadcast %33 : i1 to vector<16x1xi1>
      %35 = vector.broadcast %34 : vector<16x1xi1> to vector<16x1xi1>
      %36 = arith.xori %32, %35 : vector<16x1xi1>
      %37 = arith.andi %36, %30 : vector<16x1xi1>
      %38 = vector.broadcast %26 : i32 to vector<16x1xi32>
      %39 = arith.addi %28, %38 : vector<16x1xi32>
      %40 = arith.select %37, %39, %28 : vector<16x1xi1>, vector<16x1xi32>
      %c7_i32 = arith.constant 7 : i32
      %41 = vector.broadcast %c7_i32 : i32 to vector<16x1xi32>
      %42 = arith.cmpi slt, %40, %41 : vector<16x1xi32>
      %c16_i32_15 = arith.constant 16 : i32
      %43 = vector.broadcast %c16_i32_15 : i32 to vector<16x1xi32>
      %44 = arith.cmpi slt, %24, %43 : vector<16x1xi32>
      %45 = arith.andi %42, %44 : vector<16x1xi1>
      %46 = arith.sitofp %40 : vector<16x1xi32> to vector<16x1xf32>
      %cst_16 = arith.constant 8.000000e+00 : f32
      %47 = vector.broadcast %cst_16 : f32 to vector<16x1xf32>
      %48 = arith.divf %46, %47 : vector<16x1xf32>
      %cst_17 = arith.constant 1.000000e+00 : f32
      %49 = vector.broadcast %cst_17 : f32 to vector<16x1xf32>
      %50 = arith.subf %49, %48 : vector<16x1xf32>
      %51 = arith.mulf %50, %50 : vector<16x1xf32>
      %cst_18 = arith.constant 0.000000e+00 : f32
      %52 = vector.broadcast %cst_18 : f32 to vector<16x1xf32>
      %53 = arith.select %45, %51, %52 : vector<16x1xi1>, vector<16x1xf32>
      %c0_19 = arith.constant 0 : index
      %c0_20 = arith.constant 0 : index
      %54 = vector.load %arg5[%c0_19, %c0_20] : memref<16x1xf32, #tpu.memory_space<vmem>>, vector<16x1xf32>
      %cst_21 = arith.constant 1.000000e+00 : f32
      %55 = vector.broadcast %cst_21 : f32 to vector<16x1xf32>
      %56 = arith.select %45, %54, %55 : vector<16x1xi1>, vector<16x1xf32>
      %57 = math.log %56 : vector<16x1xf32>
      %58 = arith.mulf %53, %57 : vector<16x1xf32>
      %59 = vector.shape_cast %58 : vector<16x1xf32> to vector<1x16x1xf32>
      %cst_22 = arith.constant dense<0.000000e+00> : vector<1xf32>
      %60 = vector.multi_reduction <add>, %59, %cst_22 [1, 2] : vector<1x16x1xf32> to vector<1xf32>
      %61 = vector.shape_cast %60 : vector<1xf32> to vector<1x1x1xf32>
      %62 = vector.extract %61[0, 0, 0] : f32 from vector<1x1x1xf32>
      %63 = vector.broadcast %62 : f32 to vector<1x8x128xf32>
      %c0_23 = arith.constant 0 : index
      %c0_24 = arith.constant 0 : index
      %c0_25 = arith.constant 0 : index
      %64 = vector.load %arg4[%c0_23, %c0_24, %c0_25] : memref<1x8x128xf32, #tpu.memory_space<vmem>>, vector<1x8x128xf32>
      tpu.vector_store %arg4[%c0_23, %c0_24, %c0_25], %63 {strides = array<i32>} : memref<1x8x128xf32, #tpu.memory_space<vmem>>, vector<1x8x128xf32>,
    } else {
    }
    return
  }
  func.func @transform_0(%arg0: i32, %arg1: i32) -> (i32, i32) {
    %c0_i32 = arith.constant 0 : i32
    %c0_i32_0 = arith.constant 0 : i32
    return %arg0, %c0_i32 : i32, i32
  }
  func.func @transform_1(%arg0: i32, %arg1: i32) -> (i32, i32) {
    %c0_i32 = arith.constant 0 : i32
    return %arg0, %arg1 : i32, i32
  }
  func.func @transform_2(%arg0: i32, %arg1: i32) -> (i32, i32, i32) {
    %c0_i32 = arith.constant 0 : i32
    %c0_i32_0 = arith.constant 0 : i32
    %c0_i32_1 = arith.constant 0 : i32
    return %arg0, %c0_i32, %c0_i32_0 : i32, i32, i32
  }
}

</mosaic_0001>

<bundles_post_ra>
// kernel: tpu_custom_call.1
= control target key start
LH: loop header
LB: loop body
LE: loop exit
PB: predicated region body
PF: predicated region fallthrough
CT: control target
= control target key end

     0   :  { %v173_v1 = vmov 0   ;;  %s228_s0 = inlined_call_operand.vmem [shape: s32[16,1], index: 0, kind: input, shape index: {}]   ;;  %s229_s1 = inlined_call_operand.vmem [shape: f32[16,32], index: 1, kind: input, shape index: {}]   ;;  %s230_s2 = inlined_call_operand.hbm [shape: f32[1,8,128], index: 2, kind: output, shape index: {}]  }
   0x1   :  { %v21_v0 = vld [vmem:[%s228_s0] sm:$0xff]  ;;  %146 = vset.pattern.permute.xlu0 %v173_v1 }
   0x2   :  { %7 = vsyncpa [#allocation4], 0  ;;  %29 = vperm.xlu0 %146, %v21_v0   ;;  %v22_v2 = vld [vmem:[%s228_s0 + $0x8] sm:$0xff]  ;;  %v23_v3 = vlaneseq  ;;  %v19_v5 = vld [vmem:[%s229_s1] sm:$0xff]  ;;  %vm40_vm0 = vcmask 261120   ;;  %vm16_vm3 = vcmask 7168  }
   0x3   :  { %v20_v9 = vld [vmem:[%s229_s1 + $0x8] sm:$0xff]  ;;  %v174_v12 = vmov 0.0   ;;  %s175_s0 = smov [#allocation3]  }
   0x4   :  { %v24_v4 = vand.u32 127, %v23_v3  ;;  %17 = vst.msk [vmem:[#allocation2] sm:$0xff] %vm16_vm3, %v174_v12  ;;  %18 = vst.msk [vmem:[#allocation2 + $0x8] sm:$0xff] %vm16_vm3, %v174_v12  ;;  %v56_v15 = vshrl.u32 %v23_v3, 7  ;;  %s133_s1 = sshll.u32 %s175_s0, 4  ;;  %s134_s1 = int_to_ptr.vmem [resolvable:$true] %s133_s1 }
   0x5   :  { %s151_s18 = scalar_lea.vmem %s134_s1, 128  ;;  %p156_p1 = scmp.lt.s32.totalorder %s134_s1, %s134_s1 }
   0x6   :  { %32 = vperm.xlu0 %146, %v22_v2   ;;  %v57_v19 = vadd.s32 8, %v56_v15  ;;  %v66_v21 = vand.u32 7, %v56_v15  ;;  %p152_p0 = scmp.ne.s32.totalorder %s134_s1, %s151_s18  ;;  %p157_p2 = scmp.lt.s32.totalorder %s151_s18, %s151_s18 }
   0x8   :  { %v73_v23 = vand.u32 7, %v57_v19  ;;  %vm207_vm4 = vcmp.lt.s32.totalorder %v66_v21, 7  ;;  %v92_v26 = vcvt.s32.f32 %v66_v21  ;;  %p158_p3 = por %p157_p2, %p156_p1 }
   0xa   :  { %vm213_vm5 = vcmp.lt.s32.totalorder %v73_v23, 7  ;;  %v93_v29 = vcvt.s32.f32 %v73_v23  ;;  %v95_v31 = vmul.f32 0.125, %v92_v26  ;;  %p159_p4 = pnand %p158_p3, %p152_p0 }
   0xb   :  { %v36_v14 = vld [vmem:[#allocation2] sm:$0xff]  ;;  %v37_v18 = vld [vmem:[#allocation2 + $0x8] sm:$0xff] }
   0xc   :  { %v96_v33 = vmul.f32 0.125, %v93_v29  ;;  %v97_v34 = vsub.f32 1.0, %v95_v31 }
   0xe   :  { %v98_v35 = vsub.f32 1.0, %v96_v33  ;;  %v99_v36 = vmul.f32 %v97_v34, %v97_v34 }
  0x10   :  { %v100_v38 = vmul.f32 %v98_v35, %v98_v35  ;;  %v101_v40 = vsel %vm207_vm4, %v99_v36, 0.0 }
  0x12   :  { %v102_v42 = vsel %vm213_vm5, %v100_v38, 0.0 }
  0x7d   :  { %v30_v6 = vpop.permute.xlu0 %29 }
  0x7e   :  { %vm34_vm1 = vcmp.eq.s32.totalorder %v24_v4, %v30_v6 }
  0x7f   :  { %v38_v7 = vsel %vm34_vm1, %v19_v5, 0.0 }
  0x80   :  { %v41_v8 = vsel %vm40_vm0, %v38_v7, 0.0 }
  0x81   :  { %v33_v10 = vpop.permute.xlu0 %32  ;;  %42 = vadd.xlane.f32.xlu1 %v41_v8 }
  0x82   :  { %vm35_vm2 = vcmp.eq.s32.totalorder %v24_v4, %v33_v10 }
  0x83   :  { %v39_v11 = vsel %vm35_vm2, %v20_v9, 0.0 }
  0x84   :  { %v44_v13 = vsel %vm40_vm0, %v39_v11, 0.0 }
  0x85   :  { %45 = vadd.xlane.f32.xlu1 %v44_v13 }
 0x10a   :  { %v43_v16 = vpop.xlane.xlu1 %42 }
 0x10b   :  { %v47_v17 = vadd.f32 %v43_v16, %v36_v14 }
 0x10d   :  { %50 = vst.msk [vmem:[#allocation2] sm:$0xff] %vm16_vm3, %v47_v17 }
 0x10e   :  { %v46_v20 = vpop.xlane.xlu1 %45 }
 0x10f   :  { %v48_v22 = vadd.f32 %v46_v20, %v37_v18 }
 0x111   :  { %51 = vst.msk [vmem:[#allocation2 + $0x8] sm:$0xff] %vm16_vm3, %v48_v22 }
 0x114   :  { %v103_v25 = vld [vmem:[#allocation2] sm:$0xff] }
 0x115   :  { %v105_v27 = vsel %vm207_vm4, %v103_v25, 1.0 }
 0x116   :  { %147 = vlog2.f32 %v105_v27 }
 0x118   :  { %v104_v30 = vld [vmem:[#allocation2 + $0x8] sm:$0xff] }
 0x119   :  { %v106_v32 = vsel %vm213_vm5, %v104_v30, 1.0 }
 0x11a   :  { %149 = vlog2.f32 %v106_v32 }
 0x123   :  { %v148_v37 = vpop.eup %147 }
 0x124   :  { %v108_v39 = vmul.f32 0.6931472, %v148_v37 }
 0x126   :  { %v111_v44 = vmul.f32 %v108_v39, %v101_v40 }
 0x127   :  { %v150_v41 = vpop.eup %149 }
 0x128   :  { %v110_v43 = vmul.f32 0.6931472, %v150_v41  ;;  %v113_v46 = vsel %vm16_vm3, %v111_v44, 0.0 }
 0x12a   :  { %v112_v45 = vmul.f32 %v110_v43, %v102_v42 }
 0x12c   :  { %v114_v47 = vsel %vm16_vm3, %v112_v45, 0.0 }
 0x12d   :  { %v115_v48 = vadd.f32 %v114_v47, %v113_v46 }
 0x12f   :  { %116 = vadd.xlane.f32.xlu0 %v115_v48 }
 0x1b8   :  { %v117_v49 = vpop.xlane.xlu0 %116 }
 0x1b9   :  { %v118_v50 = vrot.slane %v117_v49, 4 }
 0x1bb   :  { %v119_v51 = vadd.f32 %v118_v50, %v117_v49 }
 0x1bd   :  { %v120_v52 = vrot.slane %v119_v51, 2 }
 0x1bf   :  { %v121_v53 = vadd.f32 %v120_v52, %v119_v51 }
 0x1c1   :  { %v122_v54 = vrot.slane %v121_v53, 1 }
 0x1c3   :  { %v123_v55 = vadd.f32 %v122_v54, %v121_v53 }
 0x1c5   :  { %141 = vpush %v123_v55 }
 0x1f6   :  { %s142_s17 = spop %141 }
 0x1f7   :  { %v125_v56 = vstv %s142_s17 }
 0x1f8   :  { %126 = vst [vmem:[#allocation3] sm:$0xff] %v125_v56 }
 0x1f9   :  { %162 = shalt.err (!%p159_p4)
}
 0x1fa   :  { %136 = dma.vmem_to_hbm [thread:$0]  %s134_s1, 128, %s230_s2, [#allocation4]  }
 0x1fb   :  { %171 = dma.done.wait [#allocation4], 128  }
 0x1fc   :  { %172 = vsyncadd [#allocation4], 4294967168 }
 0x1fd   :  { %140 = vsyncpa [#allocation4], 1 }

</bundles_post_ra>
